<compile_context>
chip_gen: v5e
topology: v5e:2x2
jax: 0.10.0
libtpu: 0.0.40
codegen_flags: <defaults>
</compile_context>

<pallas_src>
import jax
import jax.numpy as jnp
from jax.experimental import pallas as pl
from jax.experimental.pallas import tpu as pltpu

# ----------------------------- hyper-params ---------------------------------
B = 2
C = 3
H = W = 16
PATCH = 4
N_PATCH = (H // PATCH) * (W // PATCH)       # 16 patches per image
PATCH_DIM = PATCH * PATCH * C               # 48
ENC_DIM = 32                                # image_encoder hidden size
MF_DIM = 64                                 # m_former hidden size
DEC_DIM = 48                                # decoder hidden size
CB_DIM = 32                                 # codebook_dim
CODEBOOK_SIZE = 64
QUERY_NUM = 8
LANE = 128                                  # TPU lane width (pad target)

COMMIT_LOSS_W = 1.0
RECON_LOSS_W = 1.0
RECON_HIDDEN_LOSS_W = 1.0
PERCEPTUAL_LOSS_W = 1.0

NP_PAIR = 2 * N_PATCH                       # cond + target patches per pair (32)


# ------------------------------- fused kernel --------------------------------
def _fused_forward_kernel(
    # per-pair input ----------------------------------------------------------
    tok_ref,                                 # (NP_PAIR, LANE) [cond ; target], zero padded
    # resident fused weights --------------------------------------------------
    enc_kv_w_ref, enc_kv_b_ref,              # encoder folded into M-Former K|V
    q_mf_ref,                                # precomputed, pre-scaled queries (8, 64)
    od_w_ref, od_b_ref,                      # mf out-proj fused into down_w1
    down_w2_ref, down_b2_ref,
    cb_ref, c2_ref,                          # codebook + precomputed |c|^2
    up_w1_ref, up_b1_ref,
    upkv_w_ref, upkv_b_ref,                  # up_w2 fused into decoder K|V
    dec_emb_w_ref, dec_emb_b_ref,            # decoder patch embed (+pos in bias)
    dec_wq_ref, dec_bq_ref,                  # decoder Q proj (scale folded in)
    dec_head_w_ref, dec_head_b_ref,          # decoder head (padded to LANE)
    # per-pair outputs --------------------------------------------------------
    recons_ref,                              # (N_PATCH, LANE) recon patches (padded)
    meta_ref,                                # (QUERY_NUM, LANE) packed scalars + indices
):
    f32 = jnp.float32
    tok = tok_ref[...]                                               # (32, 128)

    # -------- frozen image encoder fused into M-Former K|V projection --------
    kv = (jnp.dot(tok, enc_kv_w_ref[...], preferred_element_type=f32)
          + enc_kv_b_ref[...])                                       # (32, 128)
    k = kv[:, :MF_DIM]                                               # (32, 64)
    v = kv[:, MF_DIM:]                                               # (32, 64)

    # -------- M-Former cross-attention (queries precomputed & pre-scaled) ----
    s = jax.lax.dot_general(q_mf_ref[...], k, (((1,), (1,)), ((), ())),
                            preferred_element_type=f32)              # (8, 32)
    s = s - jnp.max(s, axis=-1, keepdims=True)
    p = jnp.exp(s)
    p = p * pl.reciprocal(jnp.sum(p, axis=-1, keepdims=True), approx=True)
    attn = jnp.dot(p, v, preferred_element_type=f32)                 # (8, 64)

    # -------- (out-proj + vq_down linear1) fused -> Tanh -> linear2 ----------
    h1 = jnp.tanh(jnp.dot(attn, od_w_ref[...], preferred_element_type=f32)
                  + od_b_ref[...])                                   # (8, 48)
    lm_down = (jnp.dot(h1, down_w2_ref[...], preferred_element_type=f32)
               + down_b2_ref[...])                                   # (8, 32)

    # -------- vector quantizer (reduced distance proxy: c2 - 2 x.c) ----------
    cb = cb_ref[...]                                                 # (64, 32)
    xc = jax.lax.dot_general(lm_down, cb, (((1,), (1,)), ((), ())),
                             preferred_element_type=f32)             # (8, 64)
    dist = c2_ref[...] - 2.0 * xc                                    # (8, 64)
    dmin = jnp.min(dist, axis=-1, keepdims=True)
    code_iota = jax.lax.broadcasted_iota(jnp.int32, dist.shape, 1)
    cand = jnp.where(dist <= dmin, code_iota, jnp.int32(CODEBOOK_SIZE))
    idx = jnp.min(cand, axis=-1, keepdims=True)                      # first-argmin (8, 1)
    onehot = (code_iota == idx).astype(f32)                          # (8, 64)
    quant = jnp.dot(onehot, cb, preferred_element_type=f32)          # (8, 32)
    dq = lm_down - quant
    commit_sse = jnp.sum(dq * dq, keepdims=True)                     # (1, 1)

    # -------- vq_up linear1 -> Tanh -> (up_w2 + decoder K|V) fused ------------
    # TODO(synk): straight-through estimator / codebook-vs-commitment loss split
    # only matters for training gradients; forward values match the reference.
    h2 = jnp.tanh(jnp.dot(quant, up_w1_ref[...], preferred_element_type=f32)
                  + up_b1_ref[...])                                  # (8, 32)
    kv_dec = (jnp.dot(h2, upkv_w_ref[...], preferred_element_type=f32)
              + upkv_b_ref[...])                                     # (8, 96)
    k_dec = kv_dec[:, :DEC_DIM]
    v_dec = kv_dec[:, DEC_DIM:]

    # -------- decoder: cond-patch embed + cross-attn on latent motion tokens --
    cond_tok = tok[:N_PATCH]                                         # reuse, no re-read
    emb = (jnp.dot(cond_tok, dec_emb_w_ref[...], preferred_element_type=f32)
           + dec_emb_b_ref[...])                                     # (16, 48)
    q_dec = (jnp.dot(emb, dec_wq_ref[...], preferred_element_type=f32)
             + dec_bq_ref[...])                                      # scale already folded
    s2 = jax.lax.dot_general(q_dec, k_dec, (((1,), (1,)), ((), ())),
                             preferred_element_type=f32)             # (16, 8)
    s2 = s2 - jnp.max(s2, axis=-1, keepdims=True)
    p2 = jnp.exp(s2)
    p2 = p2 * pl.reciprocal(jnp.sum(p2, axis=-1, keepdims=True), approx=True)
    attn_dec = jnp.dot(p2, v_dec, preferred_element_type=f32)        # (16, 48)

    hdn = emb + attn_dec
    recons = (jnp.dot(hdn, dec_head_w_ref[...], preferred_element_type=f32)
              + dec_head_b_ref[...])                                 # (16, 128), cols>=48 are 0
    recons_ref[...] = recons                                         # lane-dense store

    # -------- reconstruction SSE fused into the epilogue -----------------------
    target_tok = tok[N_PATCH:]                          # zero-padded beyond PATCH_DIM
    dr = recons - target_tok                            # padded lanes cancel exactly to 0
    recon_sse = jnp.sum(dr * dr, keepdims=True)                      # (1, 1)

    # -------- pack per-pair scalars + indices into one lane-dense slab ---------
    row_iota = jax.lax.broadcasted_iota(jnp.int32, (QUERY_NUM, LANE), 0)
    lane_iota = jax.lax.broadcasted_iota(jnp.int32, (QUERY_NUM, LANE), 1)
    meta = (commit_sse * ((row_iota == 0) & (lane_iota == 0)).astype(f32)
            + recon_sse * ((row_iota == 0) & (lane_iota == 1)).astype(f32)
            + idx.astype(f32) * (lane_iota == 2).astype(f32))
    meta_ref[...] = meta


# ------------------------------- wrapper --------------------------------------
_WEIGHT_NAMES = (
    "enc_kv_w", "enc_kv_b", "q_mf", "od_w", "od_b",
    "down_w2", "down_b2", "codebook", "c2",
    "up_w1", "up_b1", "upkv_w", "upkv_b",
    "dec_emb_w", "dec_emb_b", "dec_wq", "dec_bq",
    "dec_head_w", "dec_head_b",
)


def _resident_spec(arr):
    nd = arr.ndim
    return pl.BlockSpec(tuple(arr.shape), lambda b, _nd=nd: (0,) * _nd)


def fused_forward_call(fp, tok_pad):
    weights = [fp[n] for n in _WEIGHT_NAMES]
    in_specs = ([pl.BlockSpec((None, NP_PAIR, LANE), lambda b: (b, 0, 0))]
                + [_resident_spec(w) for w in weights])
    out_specs = (
        pl.BlockSpec((None, N_PATCH, LANE), lambda b: (b, 0, 0)),
        pl.BlockSpec((None, QUERY_NUM, LANE), lambda b: (b, 0, 0)),
    )
    return pl.pallas_call(
        _fused_forward_kernel,
        grid=(B,),
        out_shape=(
            jax.ShapeDtypeStruct((B, N_PATCH, LANE), jnp.float32),   # recon patches (padded)
            jax.ShapeDtypeStruct((B, QUERY_NUM, LANE), jnp.float32), # packed scalars+indices
        ),
        in_specs=in_specs,
        out_specs=out_specs,
        compiler_params=pltpu.CompilerParams(
            dimension_semantics=("parallel",),       # megacore sharding on v7x
            vmem_limit_bytes=16 * 1024 * 1024,       # tiny footprint, explicit headroom
        ),
    )(tok_pad, *weights)


# ------------------------------- glue (JAX) ------------------------------------
def patchify(x):
    # (B, C, H, W) -> (B, N_PATCH, PATCH_DIM)
    x = x.reshape(B, C, H // PATCH, PATCH, W // PATCH, PATCH)
    x = x.transpose(0, 2, 4, 3, 5, 1)
    return x.reshape(B, N_PATCH, PATCH_DIM)


def unpatchify(tokens):
    # (B, N_PATCH, PATCH_DIM) -> (B, C, H, W)
    x = tokens.reshape(B, H // PATCH, W // PATCH, PATCH, PATCH, C)
    x = x.transpose(0, 5, 1, 3, 2, 4)
    return x.reshape(B, C, H, W)


def forward(fused_params, cond_pixel_values, target_pixel_values):
    # single patchify shared by encoder and decoder; pad to 128 lanes (lane-dense)
    cond_tok = patchify(cond_pixel_values)                            # (B, 16, 48)
    target_tok = patchify(target_pixel_values)                        # (B, 16, 48)
    tok = jnp.concatenate([cond_tok, target_tok], axis=1)             # (B, 32, 48)
    tok_pad = jnp.pad(tok, ((0, 0), (0, 0), (0, LANE - PATCH_DIM)))   # (B, 32, 128)

    recons_pad, meta = fused_forward_call(fused_params, tok_pad)

    commit_loss = jnp.sum(meta[:, 0, 0]) / (B * QUERY_NUM * CB_DIM)
    recons_loss = jnp.sum(meta[:, 0, 1]) / (B * N_PATCH * PATCH_DIM)
    indices = meta[:, :, 2].astype(jnp.int32)                         # (B, QUERY_NUM)
    usage = jnp.any(indices.reshape(-1)[:, None]
                    == jnp.arange(CODEBOOK_SIZE)[None, :], axis=0)
    active_code_num = jnp.sum(usage.astype(jnp.float32))
    recons_pixel_values = unpatchify(recons_pad[:, :, :PATCH_DIM])

    # TODO(synk): LPIPS perceptual loss requires a pretrained VGG; no in-script
    # Pallas equivalent -> contributes 0 here.
    perceptual_loss = jnp.zeros_like(recons_loss)
    # hidden_state_decoder is None in this config -> hidden recon loss stays 0
    # and (matching the reference) is not added to the total loss.
    recons_hidden_loss = jnp.zeros_like(commit_loss)

    loss = (COMMIT_LOSS_W * commit_loss
            + RECON_LOSS_W * recons_loss
            + PERCEPTUAL_LOSS_W * perceptual_loss)

    return {
        "loss": loss,
        "commit_loss": commit_loss,
        "recons_loss": recons_loss,
        "recons_hidden_loss": recons_hidden_loss,
        "perceptual_loss": perceptual_loss,
        "active_code_num": active_code_num,
        "recons_pixel_values": recons_pixel_values,
        "indices": indices,
    }


# ------------------------------ parameters -------------------------------------
def init_params(key):
    """Raw parameters mirroring the PyTorch module structure."""
    def nrm(k, shape, scale=0.02):
        return scale * jax.random.normal(k, shape, jnp.float32)

    keys = iter(jax.random.split(key, 32))
    z = lambda *s: jnp.zeros(s, jnp.float32)
    return {
        "enc_w": nrm(next(keys), (PATCH_DIM, ENC_DIM)),
        "enc_b": z(ENC_DIM),
        "enc_pos": nrm(next(keys), (N_PATCH, ENC_DIM)),
        "mf_queries": nrm(next(keys), (QUERY_NUM, MF_DIM)),
        "mf_wq": nrm(next(keys), (MF_DIM, MF_DIM)),
        "mf_bq": z(MF_DIM),
        "mf_wk": nrm(next(keys), (ENC_DIM, MF_DIM)),
        "mf_bk": z(MF_DIM),
        "mf_wv": nrm(next(keys), (ENC_DIM, MF_DIM)),
        "mf_bv": z(MF_DIM),
        "mf_wo": nrm(next(keys), (MF_DIM, MF_DIM)),
        "mf_bo": z(MF_DIM),
        "down_w1": nrm(next(keys), (MF_DIM, DEC_DIM)),
        "down_b1": z(DEC_DIM),
        "down_w2": nrm(next(keys), (DEC_DIM, CB_DIM)),
        "down_b2": z(CB_DIM),
        "codebook": nrm(next(keys), (CODEBOOK_SIZE, CB_DIM), scale=1.0),
        "up_w1": nrm(next(keys), (CB_DIM, CB_DIM)),
        "up_b1": z(CB_DIM),
        "up_w2": nrm(next(keys), (CB_DIM, DEC_DIM)),
        "up_b2": z(DEC_DIM),
        "dec_embed_w": nrm(next(keys), (PATCH_DIM, DEC_DIM)),
        "dec_embed_b": z(DEC_DIM),
        "dec_pos": nrm(next(keys), (N_PATCH, DEC_DIM)),
        "dec_wq": nrm(next(keys), (DEC_DIM, DEC_DIM)),
        "dec_bq": z(DEC_DIM),
        "dec_wk": nrm(next(keys), (DEC_DIM, DEC_DIM)),
        "dec_bk": z(DEC_DIM),
        "dec_wv": nrm(next(keys), (DEC_DIM, DEC_DIM)),
        "dec_bv": z(DEC_DIM),
        "dec_head_w": nrm(next(keys), (DEC_DIM, PATCH_DIM)),
        "dec_head_b": z(PATCH_DIM),
    }


def prepare_fused_params(p):
    """One-time host-side prep: fold adjacent linear layers, precompute constant
    queries / codebook norms, zero-pad HBM-boundary weights to 128 lanes.
    Mathematically identical to applying the raw layers sequentially."""
    def pad_rows(w, rows):
        return jnp.pad(w, ((0, rows - w.shape[0]), (0, 0)))

    def pad_cols(w, cols):
        return jnp.pad(w, ((0, 0), (0, cols - w.shape[1])))

    # --- frozen image encoder folded into M-Former K|V projection -------------
    mf_wkv = jnp.concatenate([p["mf_wk"], p["mf_wv"]], axis=1)        # (32, 128)
    mf_bkv = jnp.concatenate([p["mf_bk"], p["mf_bv"]], axis=0)        # (128,)
    enc_w_pad = pad_rows(p["enc_w"], LANE)                            # (128, 32)
    enc_kv_w = enc_w_pad @ mf_wkv                                     # (128, 128)
    hid_bias = p["enc_b"][None, :] + p["enc_pos"]                     # (16, 32)
    hid_bias_pair = jnp.tile(hid_bias, (2, 1))                        # (32, 32) cond+target
    enc_kv_b = hid_bias_pair @ mf_wkv + mf_bkv[None, :]               # (32, 128)

    # --- constant, pre-scaled M-Former queries ---------------------------------
    q_mf = (p["mf_queries"] @ p["mf_wq"] + p["mf_bq"][None, :]) * (1.0 / (MF_DIM ** 0.5))

    # --- M-Former out proj fused into vq_down_resampler linear1 ----------------
    od_w = p["mf_wo"] @ p["down_w1"]                                  # (64, 48)
    od_b = (p["mf_bo"] @ p["down_w1"] + p["down_b1"])[None, :]        # (1, 48)

    # --- codebook squared norms (VQ distance proxy) -----------------------------
    c2 = jnp.sum(p["codebook"] * p["codebook"], axis=-1)[None, :]     # (1, 64)

    # --- vq_up linear2 fused into decoder K|V projection ------------------------
    dec_wkv = jnp.concatenate([p["dec_wk"], p["dec_wv"]], axis=1)     # (48, 96)
    dec_bkv = jnp.concatenate([p["dec_bk"], p["dec_bv"]], axis=0)     # (96,)
    upkv_w = p["up_w2"] @ dec_wkv                                     # (32, 96)
    upkv_b = (p["up_b2"] @ dec_wkv + dec_bkv)[None, :]                # (1, 96)

    # --- decoder embed / Q / head ------------------------------------------------
    dec_scale = 1.0 / (DEC_DIM ** 0.5)
    return {
        "enc_kv_w": enc_kv_w,
        "enc_kv_b": enc_kv_b,
        "q_mf": q_mf,
        "od_w": od_w,
        "od_b": od_b,
        "down_w2": p["down_w2"],
        "down_b2": p["down_b2"][None, :],
        "codebook": p["codebook"],
        "c2": c2,
        "up_w1": p["up_w1"],
        "up_b1": p["up_b1"][None, :],
        "upkv_w": upkv_w,
        "upkv_b": upkv_b,
        "dec_emb_w": pad_rows(p["dec_embed_w"], LANE),                # (128, 48)
        "dec_emb_b": p["dec_embed_b"][None, :] + p["dec_pos"],        # (16, 48) bias+pos
        "dec_wq": p["dec_wq"] * dec_scale,
        "dec_bq": (p["dec_bq"] * dec_scale)[None, :],
        "dec_head_w": pad_cols(p["dec_head_w"], LANE),                # (48, 128)
        "dec_head_b": jnp.pad(p["dec_head_b"], (0, LANE - PATCH_DIM))[None, :],
    }


# --------------------------------- main ----------------------------------------
if __name__ == "__main__":
    key = jax.random.PRNGKey(0)
    k_cond, k_tgt, k_params = jax.random.split(key, 3)
    cond_pixel_values = jax.random.normal(k_cond, (B, C, H, W), jnp.float32)
    target_pixel_values = jax.random.normal(k_tgt, (B, C, H, W), jnp.float32)

    params = prepare_fused_params(init_params(k_params))

    outputs = jax.jit(forward)(params, cond_pixel_values, target_pixel_values)
    jax.block_until_ready(outputs)
    print("KERNEL_OK")
</pallas_src>

<mosaic_0001>
module attributes {stable_mosaic.version = 11 : i64} {
  func.func @_fused_forward_kernel(%arg0: i32, %arg1: memref<1x32x128xf32, #tpu.memory_space<vmem>>, %arg2: memref<128x128xf32, #tpu.memory_space<vmem>>, %arg3: memref<32x128xf32, #tpu.memory_space<vmem>>, %arg4: memref<8x64xf32, #tpu.memory_space<vmem>>, %arg5: memref<64x48xf32, #tpu.memory_space<vmem>>, %arg6: memref<1x48xf32, #tpu.memory_space<vmem>>, %arg7: memref<48x32xf32, #tpu.memory_space<vmem>>, %arg8: memref<1x32xf32, #tpu.memory_space<vmem>>, %arg9: memref<64x32xf32, #tpu.memory_space<vmem>>, %arg10: memref<1x64xf32, #tpu.memory_space<vmem>>, %arg11: memref<32x32xf32, #tpu.memory_space<vmem>>, %arg12: memref<1x32xf32, #tpu.memory_space<vmem>>, %arg13: memref<32x96xf32, #tpu.memory_space<vmem>>, %arg14: memref<1x96xf32, #tpu.memory_space<vmem>>, %arg15: memref<128x48xf32, #tpu.memory_space<vmem>>, %arg16: memref<16x48xf32, #tpu.memory_space<vmem>>, %arg17: memref<48x48xf32, #tpu.memory_space<vmem>>, %arg18: memref<1x48xf32, #tpu.memory_space<vmem>>, %arg19: memref<48x128xf32, #tpu.memory_space<vmem>>, %arg20: memref<1x128xf32, #tpu.memory_space<vmem>>, %arg21: memref<1x16x128xf32, #tpu.memory_space<vmem>>, %arg22: memref<1x8x128xf32, #tpu.memory_space<vmem>>) attributes {dimension_semantics = [#tpu.dimension_semantics<parallel>], iteration_bounds = array<i64: 2>, scalar_prefetch = 0 : i64, scratch_operands = 0 : i64, tpu.core_type = #tpu.core_type<tc>, window_params = [{transform_indices = @transform_0, window_bounds = array<i64: 1, 32, 128>}, {pipeline_mode = #tpu.pipeline_mode<synchronous>, transform_indices = @transform_1, window_bounds = array<i64: 128, 128>}, {pipeline_mode = #tpu.pipeline_mode<synchronous>, transform_indices = @transform_2, window_bounds = array<i64: 32, 128>}, {pipeline_mode = #tpu.pipeline_mode<synchronous>, transform_indices = @transform_3, window_bounds = array<i64: 8, 64>}, {pipeline_mode = #tpu.pipeline_mode<synchronous>, transform_indices = @transform_4, window_bounds = array<i64: 64, 48>}, {pipeline_mode = #tpu.pipeline_mode<synchronous>, transform_indices = @transform_5, window_bounds = array<i64: 1, 48>}, {pipeline_mode = #tpu.pipeline_mode<synchronous>, transform_indices = @transform_6, window_bounds = array<i64: 48, 32>}, {pipeline_mode = #tpu.pipeline_mode<synchronous>, transform_indices = @transform_7, window_bounds = array<i64: 1, 32>}, {pipeline_mode = #tpu.pipeline_mode<synchronous>, transform_indices = @transform_8, window_bounds = array<i64: 64, 32>}, {pipeline_mode = #tpu.pipeline_mode<synchronous>, transform_indices = @transform_9, window_bounds = array<i64: 1, 64>}, {pipeline_mode = #tpu.pipeline_mode<synchronous>, transform_indices = @transform_10, window_bounds = array<i64: 32, 32>}, {pipeline_mode = #tpu.pipeline_mode<synchronous>, transform_indices = @transform_11, window_bounds = array<i64: 1, 32>}, {pipeline_mode = #tpu.pipeline_mode<synchronous>, transform_indices = @transform_12, window_bounds = array<i64: 32, 96>}, {pipeline_mode = #tpu.pipeline_mode<synchronous>, transform_indices = @transform_13, window_bounds = array<i64: 1, 96>}, {pipeline_mode = #tpu.pipeline_mode<synchronous>, transform_indices = @transform_14, window_bounds = array<i64: 128, 48>}, {pipeline_mode = #tpu.pipeline_mode<synchronous>, transform_indices = @transform_15, window_bounds = array<i64: 16, 48>}, {pipeline_mode = #tpu.pipeline_mode<synchronous>, transform_indices = @transform_16, window_bounds = array<i64: 48, 48>}, {pipeline_mode = #tpu.pipeline_mode<synchronous>, transform_indices = @transform_17, window_bounds = array<i64: 1, 48>}, {pipeline_mode = #tpu.pipeline_mode<synchronous>, transform_indices = @transform_18, window_bounds = array<i64: 48, 128>}, {pipeline_mode = #tpu.pipeline_mode<synchronous>, transform_indices = @transform_19, window_bounds = array<i64: 1, 128>}, {transform_indices = @transform_20, window_bounds = array<i64: 1, 16, 128>}, {transform_indices = @transform_21, window_bounds = array<i64: 1, 8, 128>}]} {
    %c0 = arith.constant 0 : index
    %c0_0 = arith.constant 0 : index
    %c0_1 = arith.constant 0 : index
    %0 = vector.load %arg1[%c0, %c0_0, %c0_1] : memref<1x32x128xf32, #tpu.memory_space<vmem>>, vector<1x32x128xf32>
    %1 = vector.shape_cast %0 : vector<1x32x128xf32> to vector<32x128xf32>
    %c0_2 = arith.constant 0 : index
    %c0_3 = arith.constant 0 : index
    %2 = vector.load %arg2[%c0_2, %c0_3] : memref<128x128xf32, #tpu.memory_space<vmem>>, vector<128x128xf32>
    %cst = arith.constant dense<0.000000e+00> : vector<32x128xf32>
    %3 = tpu.matmul %1, %2, %cst {dimension_numbers = #tpu.dot_dimension_numbers<[1], [0], [0], [1], [0, 0, 1, 1], [], []>} : vector<32x128xf32>, vector<128x128xf32>, vector<32x128xf32> -> vector<32x128xf32>
    %c0_4 = arith.constant 0 : index
    %c0_5 = arith.constant 0 : index
    %4 = vector.load %arg3[%c0_4, %c0_5] : memref<32x128xf32, #tpu.memory_space<vmem>>, vector<32x128xf32>
    %5 = arith.addf %3, %4 : vector<32x128xf32>
    %6 = vector.extract_strided_slice %5 {offsets = [0, 0], sizes = [32, 64], strides = [1, 1]} : vector<32x128xf32> to vector<32x64xf32>
    %7 = vector.extract_strided_slice %5 {offsets = [0, 64], sizes = [32, 64], strides = [1, 1]} : vector<32x128xf32> to vector<32x64xf32>
    %c0_6 = arith.constant 0 : index
    %c0_7 = arith.constant 0 : index
    %8 = vector.load %arg4[%c0_6, %c0_7] : memref<8x64xf32, #tpu.memory_space<vmem>>, vector<8x64xf32>
    %cst_8 = arith.constant dense<0.000000e+00> : vector<8x32xf32>
    %9 = tpu.matmul %8, %6, %cst_8 {dimension_numbers = #tpu.dot_dimension_numbers<[1], [1], [0], [0], [0, 0, 1, 0], [], []>} : vector<8x64xf32>, vector<32x64xf32>, vector<8x32xf32> -> vector<8x32xf32>
    %cst_9 = arith.constant dense<0xFF800000> : vector<8xf32>
    %10 = vector.multi_reduction <maximumf>, %9, %cst_9 [1] : vector<8x32xf32> to vector<8xf32>
    %11 = vector.shape_cast %10 : vector<8xf32> to vector<8x1xf32>
    %12 = vector.broadcast %11 : vector<8x1xf32> to vector<8x32xf32>
    %13 = arith.subf %9, %12 : vector<8x32xf32>
    %14 = math.exp %13 : vector<8x32xf32>
    %cst_10 = arith.constant dense<0.000000e+00> : vector<8xf32>
    %15 = vector.multi_reduction <add>, %14, %cst_10 [1] : vector<8x32xf32> to vector<8xf32>
    %16 = vector.shape_cast %15 : vector<8xf32> to vector<8x1xf32>
    %17 = tpu.reciprocal %16 {approx = true} : vector<8x1xf32> -> vector<8x1xf32>
    %18 = vector.broadcast %17 : vector<8x1xf32> to vector<8x32xf32>
    %19 = arith.mulf %14, %18 : vector<8x32xf32>
    %cst_11 = arith.constant dense<0.000000e+00> : vector<8x64xf32>
    %20 = tpu.matmul %19, %7, %cst_11 {dimension_numbers = #tpu.dot_dimension_numbers<[1], [0], [0], [1], [0, 0, 1, 1], [], []>} : vector<8x32xf32>, vector<32x64xf32>, vector<8x64xf32> -> vector<8x64xf32>
    %c0_12 = arith.constant 0 : index
    %c0_13 = arith.constant 0 : index
    %21 = vector.load %arg5[%c0_12, %c0_13] : memref<64x48xf32, #tpu.memory_space<vmem>>, vector<64x48xf32>
    %cst_14 = arith.constant dense<0.000000e+00> : vector<8x48xf32>
    %22 = tpu.matmul %20, %21, %cst_14 {dimension_numbers = #tpu.dot_dimension_numbers<[1], [0], [0], [1], [0, 0, 1, 1], [], []>} : vector<8x64xf32>, vector<64x48xf32>, vector<8x48xf32> -> vector<8x48xf32>
    %c0_15 = arith.constant 0 : index
    %c0_16 = arith.constant 0 : index
    %23 = vector.load %arg6[%c0_15, %c0_16] : memref<1x48xf32, #tpu.memory_space<vmem>>, vector<1x48xf32>
    %24 = vector.broadcast %23 : vector<1x48xf32> to vector<8x48xf32>
    %25 = arith.addf %22, %24 : vector<8x48xf32>
    %26 = math.tanh %25 : vector<8x48xf32>
    %c0_17 = arith.constant 0 : index
    %c0_18 = arith.constant 0 : index
    %27 = vector.load %arg7[%c0_17, %c0_18] : memref<48x32xf32, #tpu.memory_space<vmem>>, vector<48x32xf32>
    %cst_19 = arith.constant dense<0.000000e+00> : vector<8x32xf32>
    %28 = tpu.matmul %26, %27, %cst_19 {dimension_numbers = #tpu.dot_dimension_numbers<[1], [0], [0], [1], [0, 0, 1, 1], [], []>} : vector<8x48xf32>, vector<48x32xf32>, vector<8x32xf32> -> vector<8x32xf32>
    %c0_20 = arith.constant 0 : index
    %c0_21 = arith.constant 0 : index
    %29 = vector.load %arg8[%c0_20, %c0_21] : memref<1x32xf32, #tpu.memory_space<vmem>>, vector<1x32xf32>
    %30 = vector.broadcast %29 : vector<1x32xf32> to vector<8x32xf32>
    %31 = arith.addf %28, %30 : vector<8x32xf32>
    %c0_22 = arith.constant 0 : index
    %c0_23 = arith.constant 0 : index
    %32 = vector.load %arg9[%c0_22, %c0_23] : memref<64x32xf32, #tpu.memory_space<vmem>>, vector<64x32xf32>
    %cst_24 = arith.constant dense<0.000000e+00> : vector<8x64xf32>
    %33 = tpu.matmul %31, %32, %cst_24 {dimension_numbers = #tpu.dot_dimension_numbers<[1], [1], [0], [0], [0, 0, 1, 0], [], []>} : vector<8x32xf32>, vector<64x32xf32>, vector<8x64xf32> -> vector<8x64xf32>
    %c0_25 = arith.constant 0 : index
    %c0_26 = arith.constant 0 : index
    %34 = vector.load %arg10[%c0_25, %c0_26] : memref<1x64xf32, #tpu.memory_space<vmem>>, vector<1x64xf32>
    %cst_27 = arith.constant 2.000000e+00 : f32
    %35 = vector.broadcast %cst_27 : f32 to vector<8x64xf32>
    %36 = arith.mulf %35, %33 : vector<8x64xf32>
    %37 = vector.broadcast %34 : vector<1x64xf32> to vector<8x64xf32>
    %38 = arith.subf %37, %36 : vector<8x64xf32>
    %cst_28 = arith.constant dense<0x7F800000> : vector<8xf32>
    %39 = vector.multi_reduction <minimumf>, %38, %cst_28 [1] : vector<8x64xf32> to vector<8xf32>
    %40 = vector.shape_cast %39 : vector<8xf32> to vector<8x1xf32>
    %41 = tpu.iota {dimensions = array<i32: 1>} : vector<8x64xi32>
    %42 = vector.broadcast %40 : vector<8x1xf32> to vector<8x64xf32>
    %43 = arith.cmpf ole, %38, %42 : vector<8x64xf32>
    %c64_i32 = arith.constant 64 : i32
    %44 = vector.broadcast %c64_i32 : i32 to vector<8x64xi32>
    %45 = arith.select %43, %41, %44 : vector<8x64xi1>, vector<8x64xi32>
    %cst_29 = arith.constant dense<2147483647> : vector<8xi32>
    %46 = vector.multi_reduction <minsi>, %45, %cst_29 [1] : vector<8x64xi32> to vector<8xi32>
    %47 = vector.shape_cast %46 : vector<8xi32> to vector<8x1xi32>
    %48 = vector.broadcast %47 : vector<8x1xi32> to vector<8x64xi32>
    %49 = arith.cmpi eq, %41, %48 : vector<8x64xi32>
    %50 = arith.extui %49 : vector<8x64xi1> to vector<8x64xi32>
    %51 = arith.sitofp %50 : vector<8x64xi32> to vector<8x64xf32>
    %cst_30 = arith.constant dense<0.000000e+00> : vector<8x32xf32>
    %52 = tpu.matmul %51, %32, %cst_30 {dimension_numbers = #tpu.dot_dimension_numbers<[1], [0], [0], [1], [0, 0, 1, 1], [], []>} : vector<8x64xf32>, vector<64x32xf32>, vector<8x32xf32> -> vector<8x32xf32>
    %53 = arith.subf %31, %52 : vector<8x32xf32>
    %54 = arith.mulf %53, %53 : vector<8x32xf32>
    %55 = vector.shape_cast %54 : vector<8x32xf32> to vector<1x8x32xf32>
    %cst_31 = arith.constant dense<0.000000e+00> : vector<1xf32>
    %56 = vector.multi_reduction <add>, %55, %cst_31 [1, 2] : vector<1x8x32xf32> to vector<1xf32>
    %57 = vector.shape_cast %56 : vector<1xf32> to vector<1x1x1xf32>
    %58 = vector.extract %57[0, 0, 0] : f32 from vector<1x1x1xf32>
    %59 = vector.broadcast %58 : f32 to vector<1x1xf32>
    %c0_32 = arith.constant 0 : index
    %c0_33 = arith.constant 0 : index
    %60 = vector.load %arg11[%c0_32, %c0_33] : memref<32x32xf32, #tpu.memory_space<vmem>>, vector<32x32xf32>
    %cst_34 = arith.constant dense<0.000000e+00> : vector<8x32xf32>
    %61 = tpu.matmul %52, %60, %cst_34 {dimension_numbers = #tpu.dot_dimension_numbers<[1], [0], [0], [1], [0, 0, 1, 1], [], []>} : vector<8x32xf32>, vector<32x32xf32>, vector<8x32xf32> -> vector<8x32xf32>
    %c0_35 = arith.constant 0 : index
    %c0_36 = arith.constant 0 : index
    %62 = vector.load %arg12[%c0_35, %c0_36] : memref<1x32xf32, #tpu.memory_space<vmem>>, vector<1x32xf32>
    %63 = vector.broadcast %62 : vector<1x32xf32> to vector<8x32xf32>
    %64 = arith.addf %61, %63 : vector<8x32xf32>
    %65 = math.tanh %64 : vector<8x32xf32>
    %c0_37 = arith.constant 0 : index
    %c0_38 = arith.constant 0 : index
    %66 = vector.load %arg13[%c0_37, %c0_38] : memref<32x96xf32, #tpu.memory_space<vmem>>, vector<32x96xf32>
    %cst_39 = arith.constant dense<0.000000e+00> : vector<8x96xf32>
    %67 = tpu.matmul %65, %66, %cst_39 {dimension_numbers = #tpu.dot_dimension_numbers<[1], [0], [0], [1], [0, 0, 1, 1], [], []>} : vector<8x32xf32>, vector<32x96xf32>, vector<8x96xf32> -> vector<8x96xf32>
    %c0_40 = arith.constant 0 : index
    %c0_41 = arith.constant 0 : index
    %68 = vector.load %arg14[%c0_40, %c0_41] : memref<1x96xf32, #tpu.memory_space<vmem>>, vector<1x96xf32>
    %69 = vector.broadcast %68 : vector<1x96xf32> to vector<8x96xf32>
    %70 = arith.addf %67, %69 : vector<8x96xf32>
    %71 = vector.extract_strided_slice %70 {offsets = [0, 0], sizes = [8, 48], strides = [1, 1]} : vector<8x96xf32> to vector<8x48xf32>
    %72 = vector.extract_strided_slice %70 {offsets = [0, 48], sizes = [8, 48], strides = [1, 1]} : vector<8x96xf32> to vector<8x48xf32>
    %73 = vector.extract_strided_slice %1 {offsets = [0, 0], sizes = [16, 128], strides = [1, 1]} : vector<32x128xf32> to vector<16x128xf32>
    %c0_42 = arith.constant 0 : index
    %c0_43 = arith.constant 0 : index
    %74 = vector.load %arg15[%c0_42, %c0_43] : memref<128x48xf32, #tpu.memory_space<vmem>>, vector<128x48xf32>
    %cst_44 = arith.constant dense<0.000000e+00> : vector<16x48xf32>
    %75 = tpu.matmul %73, %74, %cst_44 {dimension_numbers = #tpu.dot_dimension_numbers<[1], [0], [0], [1], [0, 0, 1, 1], [], []>} : vector<16x128xf32>, vector<128x48xf32>, vector<16x48xf32> -> vector<16x48xf32>
    %c0_45 = arith.constant 0 : index
    %c0_46 = arith.constant 0 : index
    %76 = vector.load %arg16[%c0_45, %c0_46] : memref<16x48xf32, #tpu.memory_space<vmem>>, vector<16x48xf32>
    %77 = arith.addf %75, %76 : vector<16x48xf32>
    %c0_47 = arith.constant 0 : index
    %c0_48 = arith.constant 0 : index
    %78 = vector.load %arg17[%c0_47, %c0_48] : memref<48x48xf32, #tpu.memory_space<vmem>>, vector<48x48xf32>
    %cst_49 = arith.constant dense<0.000000e+00> : vector<16x48xf32>
    %79 = tpu.matmul %77, %78, %cst_49 {dimension_numbers = #tpu.dot_dimension_numbers<[1], [0], [0], [1], [0, 0, 1, 1], [], []>} : vector<16x48xf32>, vector<48x48xf32>, vector<16x48xf32> -> vector<16x48xf32>
    %c0_50 = arith.constant 0 : index
    %c0_51 = arith.constant 0 : index
    %80 = vector.load %arg18[%c0_50, %c0_51] : memref<1x48xf32, #tpu.memory_space<vmem>>, vector<1x48xf32>
    %81 = vector.broadcast %80 : vector<1x48xf32> to vector<16x48xf32>
    %82 = arith.addf %79, %81 : vector<16x48xf32>
    %cst_52 = arith.constant dense<0.000000e+00> : vector<16x8xf32>
    %83 = tpu.matmul %82, %71, %cst_52 {dimension_numbers = #tpu.dot_dimension_numbers<[1], [1], [0], [0], [0, 0, 1, 0], [], []>} : vector<16x48xf32>, vector<8x48xf32>, vector<16x8xf32> -> vector<16x8xf32>
    %cst_53 = arith.constant dense<0xFF800000> : vector<16xf32>
    %84 = vector.multi_reduction <maximumf>, %83, %cst_53 [1] : vector<16x8xf32> to vector<16xf32>
    %85 = vector.shape_cast %84 : vector<16xf32> to vector<16x1xf32>
    %86 = vector.broadcast %85 : vector<16x1xf32> to vector<16x8xf32>
    %87 = arith.subf %83, %86 : vector<16x8xf32>
    %88 = math.exp %87 : vector<16x8xf32>
    %cst_54 = arith.constant dense<0.000000e+00> : vector<16xf32>
    %89 = vector.multi_reduction <add>, %88, %cst_54 [1] : vector<16x8xf32> to vector<16xf32>
    %90 = vector.shape_cast %89 : vector<16xf32> to vector<16x1xf32>
    %91 = tpu.reciprocal %90 {approx = true} : vector<16x1xf32> -> vector<16x1xf32>
    %92 = vector.broadcast %91 : vector<16x1xf32> to vector<16x8xf32>
    %93 = arith.mulf %88, %92 : vector<16x8xf32>
    %cst_55 = arith.constant dense<0.000000e+00> : vector<16x48xf32>
    %94 = tpu.matmul %93, %72, %cst_55 {dimension_numbers = #tpu.dot_dimension_numbers<[1], [0], [0], [1], [0, 0, 1, 1], [], []>} : vector<16x8xf32>, vector<8x48xf32>, vector<16x48xf32> -> vector<16x48xf32>
    %95 = arith.addf %77, %94 : vector<16x48xf32>
    %c0_56 = arith.constant 0 : index
    %c0_57 = arith.constant 0 : index
    %96 = vector.load %arg19[%c0_56, %c0_57] : memref<48x128xf32, #tpu.memory_space<vmem>>, vector<48x128xf32>
    %cst_58 = arith.constant dense<0.000000e+00> : vector<16x128xf32>
    %97 = tpu.matmul %95, %96, %cst_58 {dimension_numbers = #tpu.dot_dimension_numbers<[1], [0], [0], [1], [0, 0, 1, 1], [], []>} : vector<16x48xf32>, vector<48x128xf32>, vector<16x128xf32> -> vector<16x128xf32>
    %c0_59 = arith.constant 0 : index
    %c0_60 = arith.constant 0 : index
    %98 = vector.load %arg20[%c0_59, %c0_60] : memref<1x128xf32, #tpu.memory_space<vmem>>, vector<1x128xf32>
    %99 = vector.broadcast %98 : vector<1x128xf32> to vector<16x128xf32>
    %100 = arith.addf %97, %99 : vector<16x128xf32>
    %c0_61 = arith.constant 0 : index
    %c0_62 = arith.constant 0 : index
    %c0_63 = arith.constant 0 : index
    %101 = vector.load %arg21[%c0_61, %c0_62, %c0_63] : memref<1x16x128xf32, #tpu.memory_space<vmem>>, vector<1x16x128xf32>
    %102 = vector.shape_cast %101 : vector<1x16x128xf32> to vector<16x128xf32>
    %103 = vector.shape_cast %100 : vector<16x128xf32> to vector<1x16x128xf32>
    tpu.vector_store %arg21[%c0_61, %c0_62, %c0_63], %103 {strides = array<i32>} : memref<1x16x128xf32, #tpu.memory_space<vmem>>, vector<1x16x128xf32>,
    %104 = vector.extract_strided_slice %1 {offsets = [16, 0], sizes = [16, 128], strides = [1, 1]} : vector<32x128xf32> to vector<16x128xf32>
    %105 = arith.subf %100, %104 : vector<16x128xf32>
    %106 = arith.mulf %105, %105 : vector<16x128xf32>
    %107 = vector.shape_cast %106 : vector<16x128xf32> to vector<1x16x128xf32>
    %cst_64 = arith.constant dense<0.000000e+00> : vector<1xf32>
    %108 = vector.multi_reduction <add>, %107, %cst_64 [1, 2] : vector<1x16x128xf32> to vector<1xf32>
    %109 = vector.shape_cast %108 : vector<1xf32> to vector<1x1x1xf32>
    %110 = vector.extract %109[0, 0, 0] : f32 from vector<1x1x1xf32>
    %111 = vector.broadcast %110 : f32 to vector<1x1xf32>
    %112 = tpu.iota {dimensions = array<i32: 0>} : vector<8x128xi32>
    %113 = tpu.iota {dimensions = array<i32: 1>} : vector<8x128xi32>
    %c0_i32 = arith.constant 0 : i32
    %114 = vector.broadcast %c0_i32 : i32 to vector<8x128xi32>
    %115 = arith.cmpi eq, %112, %114 : vector<8x128xi32>
    %c0_i32_65 = arith.constant 0 : i32
    %116 = vector.broadcast %c0_i32_65 : i32 to vector<8x128xi32>
    %117 = arith.cmpi eq, %113, %116 : vector<8x128xi32>
    %118 = arith.andi %115, %117 : vector<8x128xi1>
    %119 = arith.extui %118 : vector<8x128xi1> to vector<8x128xi32>
    %120 = arith.sitofp %119 : vector<8x128xi32> to vector<8x128xf32>
    %121 = vector.broadcast %59 : vector<1x1xf32> to vector<8x128xf32>
    %122 = arith.mulf %121, %120 : vector<8x128xf32>
    %c0_i32_66 = arith.constant 0 : i32
    %123 = vector.broadcast %c0_i32_66 : i32 to vector<8x128xi32>
    %124 = arith.cmpi eq, %112, %123 : vector<8x128xi32>
    %c1_i32 = arith.constant 1 : i32
    %125 = vector.broadcast %c1_i32 : i32 to vector<8x128xi32>
    %126 = arith.cmpi eq, %113, %125 : vector<8x128xi32>
    %127 = arith.andi %124, %126 : vector<8x128xi1>
    %128 = arith.extui %127 : vector<8x128xi1> to vector<8x128xi32>
    %129 = arith.sitofp %128 : vector<8x128xi32> to vector<8x128xf32>
    %130 = vector.broadcast %111 : vector<1x1xf32> to vector<8x128xf32>
    %131 = arith.mulf %130, %129 : vector<8x128xf32>
    %132 = arith.addf %122, %131 : vector<8x128xf32>
    %133 = arith.sitofp %47 : vector<8x1xi32> to vector<8x1xf32>
    %c2_i32 = arith.constant 2 : i32
    %134 = vector.broadcast %c2_i32 : i32 to vector<8x128xi32>
    %135 = arith.cmpi eq, %113, %134 : vector<8x128xi32>
    %136 = arith.extui %135 : vector<8x128xi1> to vector<8x128xi32>
    %137 = arith.sitofp %136 : vector<8x128xi32> to vector<8x128xf32>
    %138 = vector.broadcast %133 : vector<8x1xf32> to vector<8x128xf32>
    %139 = arith.mulf %138, %137 : vector<8x128xf32>
    %140 = arith.addf %132, %139 : vector<8x128xf32>
    %c0_67 = arith.constant 0 : index
    %c0_68 = arith.constant 0 : index
    %c0_69 = arith.constant 0 : index
    %141 = vector.load %arg22[%c0_67, %c0_68, %c0_69] : memref<1x8x128xf32, #tpu.memory_space<vmem>>, vector<1x8x128xf32>
    %142 = vector.shape_cast %141 : vector<1x8x128xf32> to vector<8x128xf32>
    %143 = vector.shape_cast %140 : vector<8x128xf32> to vector<1x8x128xf32>
    tpu.vector_store %arg22[%c0_67, %c0_68, %c0_69], %143 {strides = array<i32>} : memref<1x8x128xf32, #tpu.memory_space<vmem>>, vector<1x8x128xf32>,
    return
  }
  func.func @transform_0(%arg0: i32) -> (i32, i32, i32) {
    %c0_i32 = arith.constant 0 : i32
    %c0_i32_0 = arith.constant 0 : i32
    %c0_i32_1 = arith.constant 0 : i32
    return %arg0, %c0_i32, %c0_i32_0 : i32, i32, i32
  }
  func.func @transform_1(%arg0: i32) -> (i32, i32) {
    %c0_i32 = arith.constant 0 : i32
    %c0_i32_0 = arith.constant 0 : i32
    %c0_i32_1 = arith.constant 0 : i32
    return %c0_i32, %c0_i32_0 : i32, i32
  }
  func.func @transform_2(%arg0: i32) -> (i32, i32) {
    %c0_i32 = arith.constant 0 : i32
    %c0_i32_0 = arith.constant 0 : i32
    %c0_i32_1 = arith.constant 0 : i32
    return %c0_i32, %c0_i32_0 : i32, i32
  }
  func.func @transform_3(%arg0: i32) -> (i32, i32) {
    %c0_i32 = arith.constant 0 : i32
    %c0_i32_0 = arith.constant 0 : i32
    %c0_i32_1 = arith.constant 0 : i32
    return %c0_i32, %c0_i32_0 : i32, i32
  }
  func.func @transform_4(%arg0: i32) -> (i32, i32) {
    %c0_i32 = arith.constant 0 : i32
    %c0_i32_0 = arith.constant 0 : i32
    %c0_i32_1 = arith.constant 0 : i32
    return %c0_i32, %c0_i32_0 : i32, i32
  }
  func.func @transform_5(%arg0: i32) -> (i32, i32) {
    %c0_i32 = arith.constant 0 : i32
    %c0_i32_0 = arith.constant 0 : i32
    %c0_i32_1 = arith.constant 0 : i32
    return %c0_i32, %c0_i32_0 : i32, i32
  }
  func.func @transform_6(%arg0: i32) -> (i32, i32) {
    %c0_i32 = arith.constant 0 : i32
    %c0_i32_0 = arith.constant 0 : i32
    %c0_i32_1 = arith.constant 0 : i32
    return %c0_i32, %c0_i32_0 : i32, i32
  }
  func.func @transform_7(%arg0: i32) -> (i32, i32) {
    %c0_i32 = arith.constant 0 : i32
    %c0_i32_0 = arith.constant 0 : i32
    %c0_i32_1 = arith.constant 0 : i32
    return %c0_i32, %c0_i32_0 : i32, i32
  }
  func.func @transform_8(%arg0: i32) -> (i32, i32) {
    %c0_i32 = arith.constant 0 : i32
    %c0_i32_0 = arith.constant 0 : i32
    %c0_i32_1 = arith.constant 0 : i32
    return %c0_i32, %c0_i32_0 : i32, i32
  }
  func.func @transform_9(%arg0: i32) -> (i32, i32) {
    %c0_i32 = arith.constant 0 : i32
    %c0_i32_0 = arith.constant 0 : i32
    %c0_i32_1 = arith.constant 0 : i32
    return %c0_i32, %c0_i32_0 : i32, i32
  }
  func.func @transform_10(%arg0: i32) -> (i32, i32) {
    %c0_i32 = arith.constant 0 : i32
    %c0_i32_0 = arith.constant 0 : i32
    %c0_i32_1 = arith.constant 0 : i32
    return %c0_i32, %c0_i32_0 : i32, i32
  }
  func.func @transform_11(%arg0: i32) -> (i32, i32) {
    %c0_i32 = arith.constant 0 : i32
    %c0_i32_0 = arith.constant 0 : i32
    %c0_i32_1 = arith.constant 0 : i32
    return %c0_i32, %c0_i32_0 : i32, i32
  }
  func.func @transform_12(%arg0: i32) -> (i32, i32) {
    %c0_i32 = arith.constant 0 : i32
    %c0_i32_0 = arith.constant 0 : i32
    %c0_i32_1 = arith.constant 0 : i32
    return %c0_i32, %c0_i32_0 : i32, i32
  }
  func.func @transform_13(%arg0: i32) -> (i32, i32) {
    %c0_i32 = arith.constant 0 : i32
    %c0_i32_0 = arith.constant 0 : i32
    %c0_i32_1 = arith.constant 0 : i32
    return %c0_i32, %c0_i32_0 : i32, i32
  }
  func.func @transform_14(%arg0: i32) -> (i32, i32) {
    %c0_i32 = arith.constant 0 : i32
    %c0_i32_0 = arith.constant 0 : i32
    %c0_i32_1 = arith.constant 0 : i32
    return %c0_i32, %c0_i32_0 : i32, i32
  }
  func.func @transform_15(%arg0: i32) -> (i32, i32) {
    %c0_i32 = arith.constant 0 : i32
    %c0_i32_0 = arith.constant 0 : i32
    %c0_i32_1 = arith.constant 0 : i32
    return %c0_i32, %c0_i32_0 : i32, i32
  }
  func.func @transform_16(%arg0: i32) -> (i32, i32) {
    %c0_i32 = arith.constant 0 : i32
    %c0_i32_0 = arith.constant 0 : i32
    %c0_i32_1 = arith.constant 0 : i32
    return %c0_i32, %c0_i32_0 : i32, i32
  }
  func.func @transform_17(%arg0: i32) -> (i32, i32) {
    %c0_i32 = arith.constant 0 : i32
    %c0_i32_0 = arith.constant 0 : i32
    %c0_i32_1 = arith.constant 0 : i32
    return %c0_i32, %c0_i32_0 : i32, i32
  }
  func.func @transform_18(%arg0: i32) -> (i32, i32) {
    %c0_i32 = arith.constant 0 : i32
    %c0_i32_0 = arith.constant 0 : i32
    %c0_i32_1 = arith.constant 0 : i32
    return %c0_i32, %c0_i32_0 : i32, i32
  }
  func.func @transform_19(%arg0: i32) -> (i32, i32) {
    %c0_i32 = arith.constant 0 : i32
    %c0_i32_0 = arith.constant 0 : i32
    %c0_i32_1 = arith.constant 0 : i32
    return %c0_i32, %c0_i32_0 : i32, i32
  }
  func.func @transform_20(%arg0: i32) -> (i32, i32, i32) {
    %c0_i32 = arith.constant 0 : i32
    %c0_i32_0 = arith.constant 0 : i32
    %c0_i32_1 = arith.constant 0 : i32
    return %arg0, %c0_i32, %c0_i32_0 : i32, i32, i32
  }
  func.func @transform_21(%arg0: i32) -> (i32, i32, i32) {
    %c0_i32 = arith.constant 0 : i32
    %c0_i32_0 = arith.constant 0 : i32
    %c0_i32_1 = arith.constant 0 : i32
    return %arg0, %c0_i32, %c0_i32_0 : i32, i32, i32
  }
}

</mosaic_0001>

<bundles_post_ra>
// kernel: forward.1
= control target key start
LH: loop header
LB: loop body
LE: loop exit
PB: predicated region body
PF: predicated region fallthrough
CT: control target
= control target key end

     0   :  { %s1984_s0 = inlined_call_operand.vmem [shape: f32[2,32,128], index: 0, kind: input, shape index: {}]   ;;  %s1985_s1 = inlined_call_operand.vmem [shape: f32[128,128], index: 1, kind: input, shape index: {}]   ;;  %s1986_s2 = inlined_call_operand.vmem [shape: f32[32,128], index: 2, kind: input, shape index: {}]   ;;  %s1987_s3 = inlined_call_operand.vmem [shape: f32[8,64], index: 3, kind: input, shape index: {}]   ;;  %s1988_s4 = inlined_call_operand.vmem [shape: f32[64,48], index: 4, kind: input, shape index: {}]   ;;  %s1989_s5 = inlined_call_operand.vmem [shape: f32[1,48], index: 5, kind: input, shape index: {}]   ;;  %s1990_s6 = inlined_call_operand.vmem [shape: f32[48,32], index: 6, kind: input, shape index: {}]   ;;  %s1991_s7 = inlined_call_operand.vmem [shape: f32[1,32], index: 7, kind: input, shape index: {}]   ;;  %s1992_s8 = inlined_call_operand.vmem [shape: f32[64,32], index: 8, kind: input, shape index: {}]   ;;  %s1993_s9 = inlined_call_operand.vmem [shape: f32[1,64], index: 9, kind: input, shape index: {}]   ;;  %s1994_s10 = inlined_call_operand.vmem [shape: f32[32,32], index: 10, kind: input, shape index: {}]   ;;  %s1995_s11 = inlined_call_operand.vmem [shape: f32[1,32], index: 11, kind: input, shape index: {}]   ;;  %s1996_s12 = inlined_call_operand.vmem [shape: f32[32,96], index: 12, kind: input, shape index: {}]   ;;  %s1997_s13 = inlined_call_operand.vmem [shape: f32[1,96], index: 13, kind: input, shape index: {}]   ;;  %s1998_s14 = inlined_call_operand.vmem [shape: f32[128,48], index: 14, kind: input, shape index: {}]   ;;  %s1999_s15 = inlined_call_operand.vmem [shape: f32[16,48], index: 15, kind: input, shape index: {}]   ;;  %s2000_s16 = inlined_call_operand.vmem [shape: f32[48,48], index: 16, kind: input, shape index: {}]   ;;  %s2001_s17 = inlined_call_operand.vmem [shape: f32[1,48], index: 17, kind: input, shape index: {}]   ;;  %s2002_s18 = inlined_call_operand.vmem [shape: f32[48,128], index: 18, kind: input, shape index: {}]   ;;  %s2003_s19 = inlined_call_operand.vmem [shape: f32[1,128], index: 19, kind: input, shape index: {}]   ;;  %s2004_s20 = inlined_call_operand.vmem [shape: f32[2,16,128], index: 20, kind: output, shape index: {0}]   ;;  %s2005_s21 = inlined_call_operand.vmem [shape: f32[2,8,128], index: 21, kind: output, shape index: {1}]  }
   0x1   :  { %2010 = sst [smem:[#allocation3_spill]] %s1984_s0 }
   0x2   :  { %2011 = sst [smem:[#allocation4_spill]] %s1985_s1 }
   0x3   :  { %2012 = sst [smem:[#allocation5_spill]] %s1986_s2  ;;  %s1608_s2 = smov 0  }
   0x4   :  { %2013 = sst [smem:[#allocation6_spill]] %s1987_s3 }
   0x5   :  { %2014 = sst [smem:[#allocation7_spill]] %s1988_s4 }
   0x6   :  { %2015 = sst [smem:[#allocation8_spill]] %s1989_s5 }
   0x7 LB: > { %2016 = sst [smem:[#allocation2_spill]] %s1493_s2  ;;  %s1392_s25 = sadd.s32 4294967295, %s1493_s2   ;;  %s1493_s2 = sphi %s1608_s2, %s32_s2  }
   0x8   : > { %p1396_p0 = scmp.ge.s32.totalorder %s1493_s2, 1  ;;  %p590_p1 = scmp.lt.s32.totalorder %s1493_s2, 3 }
   0xa   : > { %p591_p2 = pnand %p1396_p0, %p590_p1 }
   0xb   : > { %s2017_s3 = sld [smem:[#allocation4_spill]] (!%p591_p2)  ;;  %p654_p3 = scmp.lt.s32.totalorder (!%p591_p2), %s1392_s25, 1 }
   0xc   : > { %594 = sbr.rel (%p591_p2) target bundleno = 2766 (0xace), region = 100  ;;  %s2018_s23 = sld [smem:[#allocation3_spill]] (!%p591_p2) }
   0xd   : > { %s2019_s27 = sld [smem:[#allocation5_spill]] (!%p591_p2)  ;;  %s1495_s30 = smov (!%p591_p2), 64  }
   0xe   : > { %s2020_s24 = sld [smem:[#allocation6_spill]] (!%p591_p2) }
   0xf   : > { %s2022_s2 = sld [smem:[#allocation8_spill]] (!%p591_p2) }
  0x11   : > { %v687_v0 = vld [vmem:[%s2017_s3 + $0x78] sm:$0xff]  ;;  %v686_v1 = vld [vmem:[%s2017_s3 + $0x70] sm:$0xff]  ;;  %v685_v2 = vld [vmem:[%s2017_s3 + $0x68] sm:$0xff]  ;;  %s2025_s25 = smov (!%p654_p3, %s1392_s25), 1  ;;  %vm722_vm0 = vcmask 523264   ;;  %vm758_vm1 = vcmask 261120  }
  0x12   : > { %692 = vmatpush.msra.mxu0 %v687_v0  ;;  %v684_v3 = vld [vmem:[%s2017_s3 + $0x60] sm:$0xff]  ;;  %v683_v4 = vld [vmem:[%s2017_s3 + $0x58] sm:$0xff]  ;;  %v682_v5 = vld [vmem:[%s2017_s3 + $0x50] sm:$0xff]  ;;  %s1437_s28 = sshll.u32 %s2025_s25, 5  ;;  %vm851_vm2 = vcmask 392192   ;;  %vm1171_vm6 = vcmask 64512  }
  0x13   : > { %v681_v6 = vld [vmem:[%s2017_s3 + $0x48] sm:$0xff]  ;;  %v680_v7 = vld [vmem:[%s2017_s3 + $0x40] sm:$0xff]  ;;  %v679_v8 = vld [vmem:[%s2017_s3 + $0x38] sm:$0xff]  ;;  %s658_s1 = scalar_lea.vmem %s2018_s23, %s1437_s28  ;;  %s2021_s28 = sld [smem:[#allocation7_spill]] }
  0x14   : > { %693 = vmatpush.msra.mxu0 %v686_v1  ;;  %v678_v9 = vld [vmem:[%s2017_s3 + $0x30] sm:$0xff]  ;;  %v677_v10 = vld [vmem:[%s2017_s3 + $0x28] sm:$0xff]  ;;  %v676_v11 = vld [vmem:[%s2017_s3 + $0x20] sm:$0xff]  ;;  %s1438_s29 = sshll.u32 %s2025_s25, 4 }
  0x15   : > { %v675_v12 = vld [vmem:[%s2017_s3 + $0x18] sm:$0xff]  ;;  %v674_v13 = vld [vmem:[%s2017_s3 + $0x10] sm:$0xff]  ;;  %v673_v14 = vld [vmem:[%s2017_s3 + $0x8] sm:$0xff]  ;;  %s663_s22 = scalar_lea.vmem %s2004_s20, %s1438_s29 }
  0x16   : > { %694 = vmatpush.msra.mxu0 %v685_v2  ;;  %v672_v15 = vld [vmem:[%s2017_s3] sm:$0xff]  ;;  %v1673_v17 = vld [vmem:[%s658_s1 + $0x8] sm:$0xff]  ;;  %v1676_v18 = vld [vmem:[%s658_s1 + $0x10] sm:$0xff] }
  0x17   : > { %v1670_v16 = vld [vmem:[%s658_s1] sm:$0xff]  ;;  %v1679_v19 = vld [vmem:[%s658_s1 + $0x18] sm:$0xff]  ;;  %v690_v23 = vld [vmem:[%s2019_s27 + $0x10] sm:$0xff] }
  0x18   : > { %695 = vmatpush.msra.mxu0 %v684_v3  ;;  %v691_v24 = vld [vmem:[%s2019_s27 + $0x18] sm:$0xff]  ;;  %v689_v29 = vld [vmem:[%s2019_s27 + $0x8] sm:$0xff]  ;;  %v688_v30 = vld [vmem:[%s2019_s27] sm:$0xff] }
  0x19   : > { %v721_v34 = vld [vmem:[%s2020_s24] sm:$0xff]  ;;  %v812_v48 = vld [vmem:[%s2021_s28 + $0x38] sm:$0xff]  ;;  %v811_v49 = vld [vmem:[%s2021_s28 + $0x30] sm:$0xff]  ;;  %s1401_s24 = sshll.u32 %s2025_s25, 3 }
  0x1a   : > { %696 = vmatpush.msra.mxu0 %v683_v4  ;;  %828 = vmatpush.msra.mxu3 %v812_v48  ;;  %v810_v50 = vld [vmem:[%s2021_s28 + $0x28] sm:$0xff]  ;;  %v809_v51 = vld [vmem:[%s2021_s28 + $0x20] sm:$0xff]  ;;  %v808_v52 = vld [vmem:[%s2021_s28 + $0x18] sm:$0xff]  ;;  %s667_s29 = scalar_lea.vmem %s2005_s21, %s1401_s24 }
  0x1b   : > { %v807_v53 = vld [vmem:[%s2021_s28 + $0x10] sm:$0xff]  ;;  %v806_v54 = vld [vmem:[%s2021_s28 + $0x8] sm:$0xff]  ;;  %v805_v58 = vld [vmem:[%s2021_s28] sm:$0xff] }
  0x1c   : > { %697 = vmatpush.msra.mxu0 %v682_v5  ;;  %829 = vmatpush.msra.mxu3 %v811_v49  ;;  %v846_v59 = vld [vmem:[%s1990_s6 + $0x28] sm:$0xff]  ;;  %v845_v61 = vld [vmem:[%s1990_s6 + $0x20] sm:$0xff]  ;;  %v844_v62 = vld [vmem:[%s1990_s6 + $0x18] sm:$0xff] }
  0x1d   : > { %v843_v63 = vld [vmem:[%s1990_s6 + $0x10] sm:$0xff]  ;;  %v842_v0 = vld [vmem:[%s1990_s6 + $0x8] sm:$0xff]  ;;  %v841_v1 = vld [vmem:[%s1990_s6] sm:$0xff] }
  0x1e   : > { %698 = vmatpush.msra.mxu0 %v681_v6  ;;  %830 = vmatpush.msra.mxu3 %v810_v50  ;;  %v882_v2 = vld [vmem:[%s1992_s8 + $0x38] sm:$0xff]  ;;  %v881_v3 = vld [vmem:[%s1992_s8 + $0x30] sm:$0xff]  ;;  %v880_v4 = vld [vmem:[%s1992_s8 + $0x28] sm:$0xff] }
  0x1f   : > { %v879_v5 = vld [vmem:[%s1992_s8 + $0x20] sm:$0xff]  ;;  %v878_v6 = vld [vmem:[%s1992_s8 + $0x18] sm:$0xff] }
  0x20   : > { %699 = vmatpush.msra.mxu0 %v680_v7  ;;  %831 = vmatpush.msra.mxu3 %v809_v51  ;;  %v877_v7 = vld [vmem:[%s1992_s8 + $0x10] sm:$0xff] }
  0x22   : > { %700 = vmatpush.msra.mxu0 %v679_v8  ;;  %832 = vmatpush.msra.mxu3 %v808_v52  ;;  %v876_v8 = vld [vmem:[%s1992_s8 + $0x8] sm:$0xff]  ;;  %v1496_v52 = vmov 0.0  }
  0x24   : > { %701 = vmatpush.msra.mxu0 %v678_v9  ;;  %833 = vmatpush.msra.mxu3 %v807_v53  ;;  %v1464_v9 = vld [vmem:[%s2022_s2] ss:$0 sm:$0xff]  ;;  %s1497_s2 = smov 80  }
  0x26   : > { %702 = vmatpush.msra.mxu0 %v677_v10  ;;  %834 = vmatpush.msra.mxu3 %v806_v54  ;;  %v996_v54 = vld [vmem:[%s1994_s10] sm:$0xff] }
  0x28   : > { %703 = vmatpush.msra.mxu0 %v676_v11  ;;  %835 = vmatpush.msra.mxu3 %v805_v58  ;;  %v1064_v58 = vld [vmem:[%s1998_s14 + $0x28] sm:$0xff] }
  0x2a   : > { %704 = vmatpush.msra.mxu0 %v675_v12  ;;  %972 = vmatpush.msrb.mxu3 %v882_v2 }
  0x2c   : > { %705 = vmatpush.msra.mxu0 %v674_v13  ;;  %973 = vmatpush.msrb.mxu3 %v881_v3  ;;  %v875_v13 = vld [vmem:[%s1992_s8] sm:$0xff] }
  0x2e   : > { %706 = vmatpush.msra.mxu0 %v673_v14  ;;  %974 = vmatpush.msrb.mxu3 %v880_v4  ;;  %v1465_v14 = vld [vmem:[%s1991_s7] ss:$0 sm:$0xff] }
  0x30   : > { %707 = vmatpush.msra.mxu0 %v672_v15  ;;  %975 = vmatpush.msrb.mxu3 %v879_v5 }
  0x31   : > { %708 = vmatmul.f32.vlgmr.msra.gmra.mxu0 %v1670_v16 }
  0x32   : > { %976 = vmatpush.msrb.mxu3 %v878_v6 }
  0x34   : > { %977 = vmatpush.msrb.mxu3 %v877_v7 }
  0x36   : > { %978 = vmatpush.msrb.mxu3 %v876_v8 }
  0x38   : > { %979 = vmatpush.msrb.mxu3 %v875_v13 }
  0x39   : > { %711 = vmatmul.f32.gmra.mxu0 %v1673_v17 }
  0x41   : > { %714 = vmatmul.f32.gmra.mxu0 %v1676_v18 }
  0x49   : > { %717 = vmatmul.f32.gmra.mxu0 %v1679_v19 }
  0xae   : > { %v709_v20 = vpop.f32.mrf.mxu0 }
  0xaf   : > { %v710_v32 = vadd.f32 %v709_v20, %v688_v30 }
  0xb6   : > { %v712_v21 = vpop.f32.mrf.mxu0 }
  0xb7   : > { %v713_v31 = vadd.f32 %v712_v21, %v689_v29  ;;  %v1466_v21 = vld [vmem:[%s1993_s9] ss:$0 sm:$0xff] }
  0xb9   : > { %v1459_v33 = vpack.i.bf16 %v710_v32, %v713_v31 }
  0xbe   : > { %v715_v22 = vpop.f32.mrf.mxu0 }
  0xbf   : > { %v716_v26 = vadd.f32 %v715_v22, %v690_v23 }
  0xc6   : > { %v718_v25 = vpop.f32.mrf.mxu0 }
  0xc7   : > { %v719_v27 = vadd.f32 %v718_v25, %v691_v24 }
  0xc9   : > { %1402 = vmatpush.xpose.msk.msra.mxu1 %vm722_vm0, %v719_v27  ;;  %v1454_v28 = vpack.i.bf16 %v716_v26, %v719_v27 }
  0xcb   : > { %1455 = vrot.lane.b32.xlu1 %v1454_v28, %s1495_s30 }
  0xcd   : > { %1403 = vmatpush.xpose.msk.msra.mxu1 %vm722_vm0, %v716_v26  ;;  %v939_v26 = vlaneseq }
  0xcf   : > { %v1796_v27 = vand.u32 127, %v939_v26 }
  0xd1   : > { %1404 = vmatpush.xpose.msk.msra.mxu1 %vm722_vm0, %v713_v31  ;;  %vm1286_vm8 = vcmp.eq.s32.totalorder %v1796_v27, 0  ;;  %vm1292_vm9 = vcmp.eq.s32.totalorder %v1796_v27, 1  ;;  %vm1300_vm12 = vcmp.eq.s32.totalorder %v1796_v27, 2 }
  0xd3   : > { %1460 = vrot.lane.b32.xlu1 %v1459_v33, %s1495_s30 }
  0xd5   : > { %1405 = vmatpush.xpose.msk.msra.mxu1 %vm722_vm0, %v710_v32 }
  0xd8   : > { %1406 = vmatmul.msk.f32.vlgmr.msra.gmra.mxu1 %vm722_vm0, %v721_v34 }
  0xd9   : > { %1410 = vmatpush.xpose.msk.msrb.mxu1 %vm758_vm1, %v882_v2  ;;  %v1031_v2 = vld [vmem:[%s1996_s12 + $0x18] sm:$0xff] }
  0xdd   : > { %1411 = vmatpush.xpose.msk.msrb.mxu1 %vm758_vm1, %v881_v3  ;;  %v1103_v3 = vld [vmem:[%s2000_s16 + $0x18] sm:$0xff] }
  0xe1   : > { %1412 = vmatpush.xpose.msk.msrb.mxu1 %vm758_vm1, %v880_v4  ;;  %v1029_v4 = vld [vmem:[%s1996_s12 + $0x8] sm:$0xff] }
  0xe5   : > { %1413 = vmatpush.xpose.msk.msrb.mxu1 %vm758_vm1, %v879_v5  ;;  %v1102_v5 = vld [vmem:[%s2000_s16 + $0x10] sm:$0xff] }
  0xe9   : > { %1414 = vmatpush.xpose.msk.msrb.mxu1 %vm758_vm1, %v878_v6  ;;  %v1028_v6 = vld [vmem:[%s1996_s12] sm:$0xff] }
  0xed   : > { %1415 = vmatpush.xpose.msk.msrb.mxu1 %vm758_vm1, %v877_v7  ;;  %v1101_v7 = vld [vmem:[%s2000_s16 + $0x8] sm:$0xff] }
  0xf1   : > { %1416 = vmatpush.xpose.msk.msrb.mxu1 %vm758_vm1, %v876_v8  ;;  %v1075_v8 = vld [vmem:[%s1999_s15] sm:$0xff] }
  0xf5   : > { %1417 = vmatpush.xpose.msk.msrb.mxu1 %vm758_vm1, %v875_v13 }
 0x13d   : > { %v1456_v35 = vpop.permute.xlu1 %1455 }
 0x13e   : > { %v1457_v36 = vunpack.i.l.bf16 %v1456_v35  ;;  %v1458_v37 = vunpack.i.h.bf16 %v1456_v35 }
 0x140   : > { %797 = vmatpush.msra.mxu2 %v1457_v36 }
 0x142   : > { %798 = vmatpush.msra.mxu2 %v1458_v37  ;;  %v1074_v37 = vld [vmem:[%s1998_s14 + $0x78] sm:$0xff] }
 0x143   : > { %1077 = vmatpush.msrb.mxu0 %v1074_v37 }
 0x145   : > { %v1461_v38 = vpop.permute.xlu1 %1460 }
 0x146   : > { %v1462_v39 = vunpack.i.l.bf16 %v1461_v38  ;;  %v1463_v40 = vunpack.i.h.bf16 %v1461_v38  ;;  %v1073_v38 = vld [vmem:[%s1998_s14 + $0x70] sm:$0xff] }
 0x147   : > { %1078 = vmatpush.msrb.mxu0 %v1073_v38 }
 0x148   : > { %799 = vmatpush.msra.mxu2 %v1462_v39  ;;  %v999_v39 = vld [vmem:[%s1994_s10 + $0x18] sm:$0xff] }
 0x14a   : > { %800 = vmatpush.msra.mxu2 %v1463_v40  ;;  %v1072_v40 = vld [vmem:[%s1998_s14 + $0x68] sm:$0xff] }
 0x14b   : > { %1079 = vmatpush.msrb.mxu0 %v1072_v40 }
 0x14c   : > { %865 = vmatpush.msrb.mxu2 %v846_v59  ;;  %v1063_v59 = vld [vmem:[%s1998_s14 + $0x20] sm:$0xff] }
 0x14e   : > { %866 = vmatpush.msrb.mxu2 %v845_v61  ;;  %v1061_v61 = vld [vmem:[%s1998_s14 + $0x10] sm:$0xff] }
 0x150   : > { %867 = vmatpush.msrb.mxu2 %v844_v62  ;;  %v1060_v62 = vld [vmem:[%s1998_s14 + $0x8] sm:$0xff] }
 0x152   : > { %868 = vmatpush.msrb.mxu2 %v843_v63  ;;  %v1059_v63 = vld [vmem:[%s1998_s14] sm:$0xff] }
 0x154   : > { %869 = vmatpush.msrb.mxu2 %v842_v0 }
 0x155   : > { %v755_v41 = vpop.f32.mrf.mxu1 }
 0x156   : > { %v759_v42 = vsel %vm758_vm1, %v755_v41, -inf  ;;  %870 = vmatpush.msrb.mxu2 %v841_v1  ;;  %v1105_v1 = vld [vmem:[%s2000_s16 + $0x28] sm:$0xff] }
 0x157   : > { %760 = vmax.xlane.f32.xlu0 %v759_v42  ;;  %v997_v42 = vld [vmem:[%s1994_s10 + $0x8] sm:$0xff] }
 0x1ca   : > { %v761_v43 = vpop.xlane.xlu0 %760 }
 0x1cb   : > { %v762_v44 = vsub.f32 %v755_v41, %v761_v43  ;;  %v998_v41 = vld [vmem:[%s1994_s10 + $0x10] sm:$0xff]  ;;  %v1071_v43 = vld [vmem:[%s1998_s14 + $0x60] sm:$0xff] }
 0x1cc   : > { %1080 = vmatpush.msrb.mxu0 %v1071_v43 }
 0x1cd   : > { %v763_v45 = vmul.f32 1.442695, %v762_v44  ;;  %v1070_v44 = vld [vmem:[%s1998_s14 + $0x58] sm:$0xff] }
 0x1ce   : > { %1081 = vmatpush.msrb.mxu0 %v1070_v44 }
 0x1cf   : > { %1471 = vpow2.f32 %v763_v45  ;;  %v1069_v45 = vld [vmem:[%s1998_s14 + $0x50] sm:$0xff] }
 0x1d0   : > { %1082 = vmatpush.msrb.mxu0 %v1069_v45 }
 0x1d5   : > { %v1472_v46 = vpop.eup %1471 }
 0x1d6   : > { %v765_v47 = vsel %vm758_vm1, %v1472_v46, 0.0 }
 0x1d7   : > { %766 = vadd.xlane.f32.xlu0 %v765_v47 }
 0x24a   : > { %v767_v55 = vpop.xlane.xlu0 %766 }
 0x24b   : > { %1473 = vrcp.f32 %v767_v55  ;;  %v1067_v55 = vld [vmem:[%s1998_s14 + $0x40] sm:$0xff] }
 0x251   : > { %v1474_v56 = vpop.eup %1473 }
 0x252   : > { %v769_v57 = vmul.f32 %v1474_v56, %v1472_v46  ;;  %v1068_v46 = vld [vmem:[%s1998_s14 + $0x48] sm:$0xff]  ;;  %v1066_v56 = vld [vmem:[%s1998_s14 + $0x38] sm:$0xff] }
 0x253   : > { %1083 = vmatpush.msrb.mxu0 %v1068_v46 }
 0x254   : > { %1407 = vmatmul.msk.f32.vlgmr.msra.gmra.mxu2 %vm758_vm1, %v769_v57  ;;  %v1065_v57 = vld [vmem:[%s1998_s14 + $0x30] sm:$0xff] }
 0x255   : > { %1019 = vmatpush.msra.mxu2 %v999_v39  ;;  %1084 = vmatpush.msrb.mxu0 %v1067_v55 }
 0x257   : > { %1020 = vmatpush.msra.mxu2 %v998_v41  ;;  %1085 = vmatpush.msrb.mxu0 %v1066_v56 }
 0x259   : > { %1021 = vmatpush.msra.mxu2 %v997_v42  ;;  %1086 = vmatpush.msrb.mxu0 %v1065_v57 }
 0x25b   : > { %1022 = vmatpush.msra.mxu2 %v996_v54  ;;  %1087 = vmatpush.msrb.mxu0 %v1064_v58 }
 0x25d   : > { %1088 = vmatpush.msrb.mxu0 %v1063_v59 }
 0x2d7   : > { %v802_v60 = vpop.f32.mrf.mxu2 }
 0x2d8   : > { %1408 = vmatmul.msk.f32.vlgmr.msra.gmra.mxu3 %vm722_vm0, %v802_v60  ;;  %v1062_v60 = vld [vmem:[%s1998_s14 + $0x18] sm:$0xff] }
 0x2d9   : > { %1089 = vmatpush.msrb.mxu0 %v1062_v60  ;;  %1126 = vmatpush.msra.mxu3 %v1105_v1 }
 0x2db   : > { %1090 = vmatpush.msrb.mxu0 %v1061_v61 }
 0x2dd   : > { %1091 = vmatpush.msrb.mxu0 %v1060_v62 }
 0x2df   : > { %1092 = vmatpush.msrb.mxu0 %v1059_v63 }
 0x2e0   : > { %1093 = vmatmul.f32.vlgmr.msrb.gmra.mxu0 %v1670_v16  ;;  %v1104_v16 = vld [vmem:[%s2000_s16 + $0x20] sm:$0xff] }
 0x2e1   : > { %1127 = vmatpush.msra.mxu3 %v1104_v16  ;;  %v1232_v16 = vld [vmem:[%s2002_s18 + $0x20] sm:$0xff] }
 0x2e3   : > { %1128 = vmatpush.msra.mxu3 %v1103_v3  ;;  %v1230_v3 = vld [vmem:[%s2002_s18 + $0x10] sm:$0xff] }
 0x2e5   : > { %1129 = vmatpush.msra.mxu3 %v1102_v5  ;;  %v1228_v5 = vld [vmem:[%s2002_s18] sm:$0xff] }
 0x2e7   : > { %1130 = vmatpush.msra.mxu3 %v1101_v7 }
 0x2e8   : > { %1096 = vmatmul.f32.gmra.mxu0 %v1673_v17  ;;  %v1030_v17 = vld [vmem:[%s1996_s12 + $0x10] sm:$0xff] }
 0x35b   : > { %v837_v10 = vpop.f32.mrf.mxu3 }
 0x35c   : > { %v838_v11 = vadd.f32 %v1464_v9, %v837_v10  ;;  %v1100_v10 = vld [vmem:[%s2000_s16] sm:$0xff] }
 0x35d   : > { %v1094_v9 = vpop.f32.mrf.mxu0  ;;  %1131 = vmatpush.msra.mxu3 %v1100_v10  ;;  %v1470_v10 = vld [vmem:[%s2003_s19] ss:$0 sm:$0xff] }
 0x35e   : > { %1475 = vtanh.f32 %v838_v11  ;;  %v1905_v11 = vadd.f32 %v1094_v9, %v1075_v8 }
 0x364   : > { %v1476_v12 = vpop.eup %1475 }
 0x365   : > { %1409 = vmatmul.msk.f32.vlgmr.msrb.gmra.mxu2 %vm851_vm2, %v1476_v12  ;;  %v1076_v12 = vld [vmem:[%s1999_s15 + $0x8] sm:$0xff]  ;;  %v1097_v13 = vpop.f32.mrf.mxu0 }
 0x366   : > { %1051 = vmatpush.msrb.mxu2 %v1031_v2  ;;  %v1233_v2 = vld [vmem:[%s2002_s18 + $0x28] sm:$0xff] }
 0x368   : > { %1052 = vmatpush.msrb.mxu2 %v1030_v17  ;;  %v1231_v17 = vld [vmem:[%s2002_s18 + $0x18] sm:$0xff] }
 0x36a   : > { %1053 = vmatpush.msrb.mxu2 %v1029_v4  ;;  %v1229_v4 = vld [vmem:[%s2002_s18 + $0x8] sm:$0xff] }
 0x36c   : > { %1054 = vmatpush.msrb.mxu2 %v1028_v6 }
 0x3e8   : > { %v872_v15 = vpop.f32.mrf.mxu2 }
 0x3e9   : > { %v1787_v20 = vadd.f32 %v1465_v14, %v872_v15  ;;  %v1912_v14 = vadd.f32 %v1097_v13, %v1076_v12  ;;  %v1467_v15 = vld [vmem:[%s1995_s11] ss:$0 sm:$0xff] }
 0x3eb   : > { %1418 = vmatmul.msk.f32.vlgmr.msrb.gmra.mxu1 %vm758_vm1, %v1787_v20 }
 0x468   : > { %v927_v22 = vpop.f32.mrf.mxu1 }
 0x469   : > { %v931_v23 = vmul.f32 2.0, %v927_v22 }
 0x46b   : > { %v935_v24 = vsub.f32 %v1466_v21, %v931_v23 }
 0x46d   : > { %v936_v25 = vsel %vm722_vm0, %v935_v24, inf }
 0x46e   : > { %937 = vmin.xlane.f32.xlu2 %v936_v25 }
 0x4e1   : > { %v938_v28 = vpop.xlane.xlu2 %937 }
 0x4e2   : > { %vm941_vm3 = vcmp.le.f32.partialorder %v935_v24, %v938_v28  ;;  %v1468_v24 = vld [vmem:[%s1997_s13] ss:$0 sm:$0xff] }
 0x4e3   : > { %v942_v29 = vsel %vm941_vm3, %v1796_v27, 64  ;;  %v1469_v28 = vld [vmem:[%s2001_s17] ss:$0 sm:$0xff] }
 0x4e4   : > { %v943_v30 = vsel %vm722_vm0, %v942_v29, 2147483647 }
 0x4e5   : > { %v945_v31 = vshra.s32 %v943_v30, 16  ;;  %v944_v33 = vand.u32 65535, %v943_v30 }
 0x4e7   : > { %v947_v32 = vcvt.s32.f32 %v945_v31  ;;  %v946_v35 = vcvt.s32.f32 %v944_v33 }
 0x4e9   : > { %948 = vmin.xlane.f32.xlu2 %v947_v32 }
 0x55c   : > { %v949_v34 = vpop.xlane.xlu2 %948 }
 0x55d   : > { %vm950_vm4 = vcmp.eq.f32.partialorder %v947_v32, %v949_v34  ;;  %v955_v47 = vcvt.f32.s32 %v949_v34 }
 0x55e   : > { %v951_v36 = vsel %vm950_vm4, %v946_v35, inf }
 0x55f   : > { %952 = vmin.xlane.f32.xlu0 %v951_v36  ;;  %v956_v49 = vshll.u32 %v955_v47, 16 }
 0x5d2   : > { %v953_v48 = vpop.xlane.xlu0 %952 }
 0x5d3   : > { %v954_v50 = vcvt.f32.s32 %v953_v48 }
 0x5d5   : > { %v1830_v51 = vadd.s32 %v956_v49, %v954_v50 }
 0x5d7   : > { %vm958_vm5 = vcmp.eq.s32.totalorder %v1796_v27, %v1830_v51 }
 0x5d8   : > { %v1419_v53 = vsel %vm958_vm5, 1.0, %v1496_v52 }
 0x5d9   : > { %1420 = vmatmul.msk.f32.vlgmr.msrb.gmra.mxu3 %vm722_vm0, %v1419_v53 }
 0x5e1   : > { %1423 = vmatmul.msk.f32.vlgmr.msra.gmra.mxu3 %vm851_vm2, %v1905_v11 }
 0x5e9   : > { %1424 = vmatmul.msk.f32.gmra.mxu3 %vm851_vm2, %v1912_v14 }
 0x65c   : > { %v1868_v0 = vpop.f32.mrf.mxu3 }
 0x65d   : > { %1421 = vmatmul.msk.f32.vlgmr.msra.gmra.mxu2 %vm758_vm1, %v1868_v0  ;;  %v984_v47 = vsub.f32 %v1787_v20, %v1868_v0 }
 0x65f   : > { %v985_v49 = vmul.f32 %v984_v47, %v984_v47 }
 0x661   : > { %v986_v50 = vsel %vm758_vm1, %v985_v49, 0.0 }
 0x664   : > { %v1133_v25 = vpop.f32.mrf.mxu3 }
 0x665   : > { %v1134_v31 = vadd.f32 %v1469_v28, %v1133_v25 }
 0x66c   : > { %v1136_v32 = vpop.f32.mrf.mxu3 }
 0x66d   : > { %v1137_v33 = vadd.f32 %v1469_v28, %v1136_v32 }
 0x6e0   : > { %v1024_v21 = vpop.f32.mrf.mxu2 }
 0x6e1   : > { %v1025_v22 = vadd.f32 %v1467_v15, %v1024_v21 }
 0x6e3   : > { %1477 = vtanh.f32 %v1025_v22 }
 0x6e9   : > { %v1478_v23 = vpop.eup %1477 }
 0x6ea   : > { %1422 = vmatmul.msk.f32.vlgmr.msrb.gmra.mxu2 %vm758_vm1, %v1478_v23 }
 0x76d   : > { %v1056_v29 = vpop.f32.mrf.mxu2 }
 0x76e   : > { %v1057_v30 = vadd.f32 %v1468_v24, %v1056_v29 }
 0x770   : > { %1425 = vmatpush.xpose.msk.msra.mxu2 %vm851_vm2, %v1057_v30 }
 0x773   : > { %1426 = vmatmul.msk.f32.vlgmr.msra.gmra.mxu2 %vm851_vm2, %v1134_v31 }
 0x774   : > { %1254 = vmatpush.msrb.mxu2 %v1233_v2 }
 0x776   : > { %1255 = vmatpush.msrb.mxu2 %v1232_v16 }
 0x778   : > { %1256 = vmatpush.msrb.mxu2 %v1231_v17 }
 0x77a   : > { %1257 = vmatpush.msrb.mxu2 %v1230_v3 }
 0x77b   : > { %1427 = vmatmul.msk.f32.gmra.mxu2 %vm851_vm2, %v1137_v33 }
 0x77c   : > { %1258 = vmatpush.msrb.mxu2 %v1229_v4 }
 0x77e   : > { %1259 = vmatpush.msrb.mxu2 %v1228_v5 }
 0x7f6   : > { %v1165_v34 = vpop.f32.mrf.mxu2 }
 0x7f7   : > { %v1172_v35 = vsel %vm1171_vm6, %v1165_v34, -inf }
 0x7f8   : > { %1173 = vmax.xlane.f32.xlu1 %v1172_v35 }
 0x7fe   : > { %v1168_v36 = vpop.f32.mrf.mxu2 }
 0x7ff   : > { %v1175_v37 = vsel %vm1171_vm6, %v1168_v36, -inf }
 0x800   : > { %1176 = vmax.xlane.f32.xlu2 %v1175_v37 }
 0x86b   : > { %v1174_v38 = vpop.xlane.xlu1 %1173 }
 0x86c   : > { %v1178_v39 = vsub.f32 %v1165_v34, %v1174_v38  ;;  %v1284_v34 = vshrl.u32 %v939_v26, 7  ;;  %v1434_v26 = vsel %vm1300_vm12, 1.0, %v1496_v52 }
 0x86e   : > { %v1180_v40 = vmul.f32 1.442695, %v1178_v39  ;;  %vm1285_vm7 = vcmp.eq.s32.totalorder %v1284_v34, 0 }
 0x86f   : > { %vm1287_vm10 = vmand %vm1285_vm7, %vm1286_vm8 }
 0x870   : > { %1479 = vpow2.f32 %v1180_v40  ;;  %vm1293_vm11 = vmand %vm1285_vm7, %vm1292_vm9 }
 0x871   : > { %v1433_v35 = vsel %vm1293_vm11, 1.0, %v1496_v52 }
 0x873   : > { %v1177_v41 = vpop.xlane.xlu2 %1176 }
 0x874   : > { %v1179_v42 = vsub.f32 %v1168_v36, %v1177_v41  ;;  %v1299_v36 = vcvt.s32.f32 %v1830_v51 }
 0x876   : > { %v1480_v43 = vpop.eup %1479  ;;  %v1182_v44 = vmul.f32 1.442695, %v1179_v42  ;;  %v1303_v40 = vmul.f32 %v1434_v26, %v1299_v36 }
 0x877   : > { %v1184_v45 = vsel %vm1171_vm6, %v1480_v43, 0.0 }
 0x878   : > { %1481 = vpow2.f32 %v1182_v44  ;;  %1185 = vadd.xlane.f32.xlu0 %v1184_v45 }
 0x87e   : > { %v1482_v46 = vpop.eup %1481 }
 0x87f   : > { %v1187_v48 = vsel %vm1171_vm6, %v1482_v46, 0.0 }
 0x880   : > { %1188 = vadd.xlane.f32.xlu2 %v1187_v48 }
 0x888   : > { %987 = vadd.xlane.f32.xlu2 %v986_v50 }
 0x88c   : > { %1194 = vrot.lane.b32.xlu0 %v1057_v30, %s1497_s2 }
 0x8eb   : > { %v1186_v53 = vpop.xlane.xlu0 %1185 }
 0x8ec   : > { %1483 = vrcp.f32 %v1186_v53 }
 0x8f2   : > { %v1484_v55 = vpop.eup %1483 }
 0x8f3   : > { %v1189_v54 = vpop.xlane.xlu2 %1188  ;;  %v1192_v58 = vmul.f32 %v1484_v55, %v1480_v43 }
 0x8f4   : > { %1485 = vrcp.f32 %v1189_v54 }
 0x8fa   : > { %v1486_v62 = vpop.eup %1485 }
 0x8fb   : > { %v988_v56 = vpop.xlane.xlu2 %987  ;;  %v1193_v1 = vmul.f32 %v1486_v62, %v1482_v46 }
 0x8fc   : > { %v989_v57 = vrot.slane %v988_v56, 4 }
 0x8fe   : > { %v990_v59 = vadd.f32 %v989_v57, %v988_v56  ;;  %v1195_v60 = vpop.permute.xlu0 %1194 }
 0x8ff   : > { %1218 = vmatpush.msra.mxu1 %v1195_v60 }
 0x900   : > { %v991_v20 = vrot.slane %v990_v59, 2  ;;  %1428 = vmatmul.msk.f32.vlgmr.msra.gmra.mxu1 %vm1171_vm6, %v1192_v58 }
 0x902   : > { %v992_v61 = vadd.f32 %v991_v20, %v990_v59 }
 0x904   : > { %v993_v63 = vrot.slane %v992_v61, 1 }
 0x906   : > { %v994_v0 = vadd.f32 %v993_v63, %v992_v61 }
 0x908   : > { %1439 = vpush %v994_v0  ;;  %1429 = vmatmul.msk.f32.gmra.mxu1 %vm1171_vm6, %v1193_v1 }
 0x939   : > { %s1440_s23 = spop %1439 }
 0x97d   : > { %v1220_v6 = vpop.f32.mrf.mxu1 }
 0x97e   : > { %v1226_v7 = vadd.f32 %v1220_v6, %v1905_v11 }
 0x980   : > { %1430 = vmatmul.msk.f32.vlgmr.msrb.gmra.mxu2 %vm851_vm2, %v1226_v7 }
 0x985   : > { %v1223_v8 = vpop.f32.mrf.mxu1 }
 0x986   : > { %v1227_v9 = vadd.f32 %v1223_v8, %v1912_v14 }
 0x988   : > { %1431 = vmatmul.msk.f32.gmra.mxu2 %vm851_vm2, %v1227_v9 }
 0xa03   : > { %v1261_v12 = vpop.f32.mrf.mxu2 }
 0xa04   : > { %v1262_v13 = vadd.f32 %v1470_v10, %v1261_v12 }
 0xa06   : > { %1267 = vst [vmem:[%s663_s22] sm:$0xff] %v1262_v13  ;;  %v1269_v15 = vsub.f32 %v1262_v13, %v1676_v18  ;;  %v1432_v18 = vsel %vm1287_vm10, 1.0, %v1496_v52 }
 0xa08   : > { %v1271_v22 = vmul.f32 %v1269_v15, %v1269_v15 }
 0xa0b   : > { %v1264_v11 = vpop.f32.mrf.mxu2 }
 0xa0c   : > { %v1265_v21 = vadd.f32 %v1470_v10, %v1264_v11 }
 0xa0e   : > { %1268 = vst [vmem:[%s663_s22 + $0x8] sm:$0xff] %v1265_v21  ;;  %v1270_v14 = vsub.f32 %v1265_v21, %v1679_v19  ;;  %v1290_v19 = vstv %s1440_s23 }
 0xa0f   : > { %v1291_v38 = vmul.f32 %v1432_v18, %v1290_v19 }
 0xa10   : > { %v1272_v23 = vmul.f32 %v1270_v14, %v1270_v14 }
 0xa12   : > { %v1273_v24 = vadd.f32 %v1272_v23, %v1271_v22 }
 0xa14   : > { %1274 = vadd.xlane.f32.xlu2 %v1273_v24 }
 0xa87   : > { %v1275_v25 = vpop.xlane.xlu2 %1274 }
 0xa88   : > { %v1276_v28 = vrot.slane %v1275_v25, 4 }
 0xa8a   : > { %v1277_v29 = vadd.f32 %v1276_v28, %v1275_v25 }
 0xa8c   : > { %v1278_v30 = vrot.slane %v1277_v29, 2 }
 0xa8e   : > { %v1279_v31 = vadd.f32 %v1278_v30, %v1277_v29 }
 0xa90   : > { %v1280_v32 = vrot.slane %v1279_v31, 1 }
 0xa92   : > { %v1281_v33 = vadd.f32 %v1280_v32, %v1279_v31 }
 0xa94   : > { %1441 = vpush %v1281_v33 }
 0xac5   : > { %s1442_s1 = spop %1441 }
 0xac6   : > { %v1296_v37 = vstv %s1442_s1 }
 0xac7   : > { %v1297_v39 = vmul.f32 %v1433_v35, %v1296_v37 }
 0xac9   : > { %v1298_v41 = vadd.f32 %v1297_v39, %v1291_v38 }
 0xacb   : > { %v1304_v27 = vadd.f32 %v1303_v40, %v1298_v41 }
 0xacd   : > { %1305 = vst [vmem:[%s667_s29] sm:$0xff] %v1304_v27 }
 0xace PF: > { %s2023_s0 = sld [smem:[#allocation2_spill]] }
 0xad4   : > { %s32_s2 = sadd.s32 1, %s2023_s0  }
 0xad5   : > { %p29_p4 = scmp.ge.s32.totalorder %s32_s2, 4  }
 0xad7   :  { %31 = sbr.rel (!%p29_p4) target bundleno = 7 (0x7), region = 142 }

</bundles_post_ra>
